<compile_context>
chip_gen: v6e
topology: v6e:2x2x1
jax: 0.10.0
libtpu: 0.0.40
codegen_flags: <defaults>
</compile_context>

<pallas_src>
import functools

import jax
import jax.numpy as jnp
from jax.experimental import pallas as pl
from jax.experimental.pallas import tpu as pltpu

LANES = 128
MAX_BLOCK_ROWS = 4096  # (4096, 128) f32 = 2 MiB per input tile; multiple of 32


def _round_up(x, m):
    return ((x + m - 1) // m) * m


def _sublane_align(dtype):
    # Native second-minor tile: f32 -> 8, bf16/f16 -> 16, int8/bool -> 32.
    itemsize = jnp.dtype(dtype).itemsize
    return max(8, 8 * (4 // max(1, itemsize)))


def _focal_loss_kernel(yhat_ref, y_ref, out_ref, *, gamma, gamma_int,
                       valid_rows, block_rows, lanes, has_tail):
    i = pl.program_id(0)

    x = yhat_ref[...].astype(jnp.float32)
    y = y_ref[...].astype(jnp.float32)

    # Stable softplus form (p = sigmoid(x)):
    #   softplus(x)  = -log(1 - p)
    #   softplus(-x) = -log(p) = softplus(x) - x
    e = jnp.exp(-jnp.abs(x))                       # EUP exp (reused below)
    sp_pos = jnp.maximum(x, 0.0) + jnp.log1p(e)    # -log(1 - p)
    sp_neg = sp_pos - x                            # -log(p)

    if gamma_int is not None:
        # Integer gamma: pow is plain VPU multiplies (lax.integer_pow).
        # Rebuild both sigmoids from e with one reciprocal instead of an
        # extra exp (also avoids the 1 - exp(-softplus) cancellation).
        r = pl.reciprocal(1.0 + e, approx=False)
        one_m_p = jnp.where(x >= 0.0, e, 1.0) * r   # sigmoid(-x) = 1 - p
        p = jnp.where(x >= 0.0, 1.0, e) * r         # sigmoid(x)  = p
        w_pos = one_m_p ** gamma_int                # (1 - p) ** gamma
        w_neg = p ** gamma_int                      # p ** gamma
    else:
        w_pos = jnp.exp(-gamma * sp_pos)            # (1 - p) ** gamma
        w_neg = jnp.exp(-gamma * sp_neg)            # p ** gamma

    # loss = y*(1-p)^g*(-log p) + (1-y)*p^g*(-log(1-p))
    loss = y * w_pos * sp_neg + (1.0 - y) * w_neg * sp_pos

    sub = block_rows // 8

    def _partial(v):
        # Leading-axis reduce = vreg-wise VPU adds only -> (8, lanes).
        return jnp.sum(v.reshape(sub, 8, lanes), axis=0)

    if has_tail:
        last = pl.num_programs(0) - 1

        @pl.when(i != last)
        def _():
            out_ref[...] = _partial(loss)

        @pl.when(i == last)
        def _():
            # Only the last block can over-run the rows dim; mask whole rows
            # (the kernel's slab is always a multiple of 128 lanes wide).
            row = jax.lax.broadcasted_iota(jnp.int32, (block_rows, lanes), 0)
            mask = (i * block_rows + row) < valid_rows
            out_ref[...] = _partial(jnp.where(mask, loss, 0.0))
    else:
        out_ref[...] = _partial(loss)


def _focal_terms_jax(x, y, gamma):
    """Tiny pure-JAX focal-loss terms (for the <128 element tail)."""
    x = x.astype(jnp.float32)
    y = y.astype(jnp.float32)
    sp_pos = jnp.maximum(x, 0.0) + jnp.log1p(jnp.exp(-jnp.abs(x)))
    sp_neg = sp_pos - x
    w_pos = jnp.exp(-gamma * sp_pos)
    w_neg = jnp.exp(-gamma * sp_neg)
    return y * w_pos * sp_neg + (1.0 - y) * w_neg * sp_pos


def focal_loss(y_hat, y, gamma):
    """Pallas TPU implementation of FocalLoss.forward(y_hat, y, gamma)."""
    assert y_hat.shape == y.shape
    total_n = int(y_hat.size)

    # gamma is a Python scalar at trace time -> bake it in statically.
    gamma = float(gamma)
    gamma_int = int(gamma) if gamma.is_integer() and 0.0 <= gamma <= 16.0 else None

    # Keep floating inputs in their native dtype (cast inside the kernel).
    # Narrow non-float targets to int8 (1 B/elem) instead of widening to f32.
    if not jnp.issubdtype(y_hat.dtype, jnp.floating):
        y_hat = y_hat.astype(jnp.float32)
    if not jnp.issubdtype(y.dtype, jnp.floating):
        y = y.astype(jnp.int8)

    if total_n == 0:
        # mean of an empty tensor -> NaN (matches PyTorch).
        return jnp.float32(jnp.nan)

    yhat_flat = y_hat.reshape(-1)
    y_flat = y.reshape(-1)

    lane_rows = total_n // LANES
    rem = total_n - lane_rows * LANES

    tail_sum = jnp.float32(0.0)
    if rem:
        # <128 leftover elements: negligible pure-JAX work in the wrapper.
        tx = jax.lax.slice(yhat_flat, (lane_rows * LANES,), (total_n,))
        ty = jax.lax.slice(y_flat, (lane_rows * LANES,), (total_n,))
        tail_sum = jnp.sum(_focal_terms_jax(tx, ty, gamma))

    if lane_rows == 0:
        # Entire input fits in the tail path; no kernel launch needed.
        return tail_sum / jnp.float32(total_n)

    main_n = lane_rows * LANES
    if rem:
        # TODO(synk): for very large ragged inputs a manual-DMA last tile
        # (memory_space=pl.ANY + make_async_copy) would avoid this prefix copy.
        yhat_main = jax.lax.slice(yhat_flat, (0,), (main_n,))
        y_main = jax.lax.slice(y_flat, (0,), (main_n,))
    else:
        yhat_main = yhat_flat
        y_main = y_flat

    yhat2d = yhat_main.reshape(lane_rows, LANES)
    y2d = y_main.reshape(lane_rows, LANES)

    # Sublane alignment for block_rows: satisfies (8/16/32, 128) tiling of the
    # widest-packed input dtype and keeps the in-kernel (sub, 8, 128) reduce.
    align = max(_sublane_align(yhat2d.dtype), _sublane_align(y2d.dtype))
    # Target >= 2 tiles so v7x's two TensorCores both get work on mid-size
    # inputs, while capping the tile at MAX_BLOCK_ROWS rows.
    block_rows = min(MAX_BLOCK_ROWS, _round_up(pl.cdiv(lane_rows, 2), align))
    num_tiles = pl.cdiv(lane_rows, block_rows)
    has_tail = num_tiles * block_rows > lane_rows

    kernel = functools.partial(
        _focal_loss_kernel,
        gamma=gamma, gamma_int=gamma_int, valid_rows=lane_rows,
        block_rows=block_rows, lanes=LANES, has_tail=has_tail)

    partials = pl.pallas_call(
        kernel,
        out_shape=jax.ShapeDtypeStruct((num_tiles * 8, LANES), jnp.float32),
        grid=(num_tiles,),
        in_specs=[
            pl.BlockSpec((block_rows, LANES), lambda i: (i, 0)),
            pl.BlockSpec((block_rows, LANES), lambda i: (i, 0)),
        ],
        out_specs=pl.BlockSpec((8, LANES), lambda i: (i, 0)),
        compiler_params=pltpu.CompilerParams(
            dimension_semantics=("parallel",)),  # v7x: split tiles over both TCs
    )(yhat2d, y2d)

    # Tiny final cross-lane reduce + normalization outside the kernel.
    return (jnp.sum(partials) + tail_sum) / jnp.float32(total_n)


def focal_loss_ref(y_hat, y, gamma):
    """Pure-JAX reference matching the PyTorch module."""
    y_hat = y_hat.astype(jnp.float32)
    y = y.astype(jnp.float32)
    p = jax.nn.sigmoid(y_hat)
    loss = -(y * (1 - p) ** gamma * jnp.log(p)
             + (1 - y) * p ** gamma * jnp.log(1 - p))
    return loss.mean()


if __name__ == "__main__":
    key = jax.random.PRNGKey(0)
    k1, k2, k3, k4, k5, k6, k7, k8 = jax.random.split(key, 8)

    # 1) (batch=2, channels=4, 16x16 spatial), float targets, integer gamma.
    y_hat = jax.random.normal(k1, (2, 4, 16, 16), dtype=jnp.float32)
    y = (jax.random.uniform(k2, (2, 4, 16, 16)) > 0.5).astype(jnp.float32)
    out = focal_loss(y_hat, y, 2.0)
    jax.block_until_ready(out)
    ref = focal_loss_ref(y_hat, y, 2.0)
    assert jnp.allclose(out, ref, rtol=1e-5, atol=1e-5), (out, ref)

    # 2) bool targets (narrow int8 path in the kernel), integer gamma.
    y_hat_b = jax.random.normal(k3, (2, 4, 32, 16), dtype=jnp.float32)
    y_b = jax.random.uniform(k4, (2, 4, 32, 16)) > 0.5
    out_b = focal_loss(y_hat_b, y_b, 3.0)
    jax.block_until_ready(out_b)
    ref_b = focal_loss_ref(y_hat_b, y_b.astype(jnp.float32), 3.0)
    assert jnp.allclose(out_b, ref_b, rtol=1e-5, atol=1e-5), (out_b, ref_b)

    # 3) rows not a multiple of block_rows: exercises the masked last tile,
    #    non-integer gamma (exp path).
    y_hat_m = jax.random.normal(k5, (2, 4, 16, 12), dtype=jnp.float32)
    y_m = (jax.random.uniform(k6, (2, 4, 16, 12)) > 0.5).astype(jnp.float32)
    out_m = focal_loss(y_hat_m, y_m, 1.5)
    jax.block_until_ready(out_m)
    ref_m = focal_loss_ref(y_hat_m, y_m, 1.5)
    assert jnp.allclose(out_m, ref_m, rtol=1e-5, atol=1e-5), (out_m, ref_m)

    # 4) tiny ragged input (<128 elements): pure-JAX tail path.
    y_hat_t = jax.random.normal(k7, (3, 5, 7), dtype=jnp.float32)
    y_t = (jax.random.uniform(k8, (3, 5, 7)) > 0.5).astype(jnp.float32)
    out_t = focal_loss(y_hat_t, y_t, 0.5)
    jax.block_until_ready(out_t)
    ref_t = focal_loss_ref(y_hat_t, y_t, 0.5)
    assert jnp.allclose(out_t, ref_t, rtol=1e-5, atol=1e-5), (out_t, ref_t)

    print("KERNEL_OK")
</pallas_src>

<mosaic_0001>
module attributes {stable_mosaic.version = 11 : i64} {
  func.func @_focal_loss_kernel(%arg0: i32, %arg1: memref<8x128xf32, #tpu.memory_space<vmem>>, %arg2: memref<8x128xf32, #tpu.memory_space<vmem>>, %arg3: memref<8x128xf32, #tpu.memory_space<vmem>>) attributes {dimension_semantics = [#tpu.dimension_semantics<parallel>], iteration_bounds = array<i64: 2>, scalar_prefetch = 0 : i64, scratch_operands = 0 : i64, tpu.core_type = #tpu.core_type<tc>, window_params = [{transform_indices = @transform_0, window_bounds = array<i64: 8, 128>}, {transform_indices = @transform_1, window_bounds = array<i64: 8, 128>}, {transform_indices = @transform_2, window_bounds = array<i64: 8, 128>}]} {
    %c0 = arith.constant 0 : index
    %c0_0 = arith.constant 0 : index
    %0 = vector.load %arg1[%c0, %c0_0] : memref<8x128xf32, #tpu.memory_space<vmem>>, vector<8x128xf32>
    %c0_1 = arith.constant 0 : index
    %c0_2 = arith.constant 0 : index
    %1 = vector.load %arg2[%c0_1, %c0_2] : memref<8x128xf32, #tpu.memory_space<vmem>>, vector<8x128xf32>
    %2 = math.absf %0 : vector<8x128xf32>
    %cst = arith.constant 0.000000e+00 : f32
    %3 = vector.broadcast %cst : f32 to vector<8x128xf32>
    %4 = arith.subf %3, %2 : vector<8x128xf32>
    %5 = math.exp %4 : vector<8x128xf32>
    %cst_3 = arith.constant 0.000000e+00 : f32
    %6 = vector.broadcast %cst_3 : f32 to vector<8x128xf32>
    %7 = arith.maximumf %0, %6 : vector<8x128xf32>
    %8 = math.log1p %5 : vector<8x128xf32>
    %9 = arith.addf %7, %8 : vector<8x128xf32>
    %10 = arith.subf %9, %0 : vector<8x128xf32>
    %cst_4 = arith.constant 1.000000e+00 : f32
    %11 = vector.broadcast %cst_4 : f32 to vector<8x128xf32>
    %12 = arith.addf %11, %5 : vector<8x128xf32>
    %13 = tpu.reciprocal %12 : vector<8x128xf32> -> vector<8x128xf32>
    %cst_5 = arith.constant 0.000000e+00 : f32
    %14 = vector.broadcast %cst_5 : f32 to vector<8x128xf32>
    %15 = arith.cmpf oge, %0, %14 : vector<8x128xf32>
    %cst_6 = arith.constant 1.000000e+00 : f32
    %16 = vector.broadcast %cst_6 : f32 to vector<8x128xf32>
    %17 = arith.select %15, %5, %16 : vector<8x128xi1>, vector<8x128xf32>
    %18 = arith.mulf %17, %13 : vector<8x128xf32>
    %cst_7 = arith.constant 0.000000e+00 : f32
    %19 = vector.broadcast %cst_7 : f32 to vector<8x128xf32>
    %20 = arith.cmpf oge, %0, %19 : vector<8x128xf32>
    %cst_8 = arith.constant 1.000000e+00 : f32
    %21 = vector.broadcast %cst_8 : f32 to vector<8x128xf32>
    %22 = arith.select %20, %21, %5 : vector<8x128xi1>, vector<8x128xf32>
    %23 = arith.mulf %22, %13 : vector<8x128xf32>
    %24 = arith.mulf %18, %18 : vector<8x128xf32>
    %25 = arith.mulf %23, %23 : vector<8x128xf32>
    %26 = arith.mulf %1, %24 : vector<8x128xf32>
    %27 = arith.mulf %26, %10 : vector<8x128xf32>
    %cst_9 = arith.constant 1.000000e+00 : f32
    %28 = vector.broadcast %cst_9 : f32 to vector<8x128xf32>
    %29 = arith.subf %28, %1 : vector<8x128xf32>
    %30 = arith.mulf %29, %25 : vector<8x128xf32>
    %31 = arith.mulf %30, %9 : vector<8x128xf32>
    %32 = arith.addf %27, %31 : vector<8x128xf32>
    %33 = vector.shape_cast %32 : vector<8x128xf32> to vector<1x8x128xf32>
    %cst_10 = arith.constant dense<0.000000e+00> : vector<8x128xf32>
    %34 = vector.multi_reduction <add>, %33, %cst_10 [0] : vector<1x8x128xf32> to vector<8x128xf32>
    %c0_11 = arith.constant 0 : index
    %c0_12 = arith.constant 0 : index
    %35 = vector.load %arg3[%c0_11, %c0_12] : memref<8x128xf32, #tpu.memory_space<vmem>>, vector<8x128xf32>
    tpu.vector_store %arg3[%c0_11, %c0_12], %34 {strides = array<i32>} : memref<8x128xf32, #tpu.memory_space<vmem>>, vector<8x128xf32>,
    return
  }
  func.func @transform_0(%arg0: i32) -> (i32, i32) {
    %c0_i32 = arith.constant 0 : i32
    %c0_i32_0 = arith.constant 0 : i32
    return %arg0, %c0_i32 : i32, i32
  }
  func.func @transform_1(%arg0: i32) -> (i32, i32) {
    %c0_i32 = arith.constant 0 : i32
    %c0_i32_0 = arith.constant 0 : i32
    return %arg0, %c0_i32 : i32, i32
  }
  func.func @transform_2(%arg0: i32) -> (i32, i32) {
    %c0_i32 = arith.constant 0 : i32
    %c0_i32_0 = arith.constant 0 : i32
    return %arg0, %c0_i32 : i32, i32
  }
}

</mosaic_0001>

<bundles_post_ra>
// kernel: tpu_custom_call.1
= control target key start
LH: loop header
LB: loop body
LE: loop exit
PB: predicated region body
PF: predicated region fallthrough
CT: control target
= control target key end

     0   :  { %7 = vsyncpa [#allocation3], 0  ;;  %s753_s0 = inlined_call_operand.hbm [shape: f32[16,128], index: 0, kind: input, shape index: {}]   ;;  %s754_s1 = inlined_call_operand.hbm [shape: f32[16,128], index: 1, kind: input, shape index: {}]   ;;  %s755_s2 = inlined_call_operand.hbm [shape: f32[16,128], index: 2, kind: output, shape index: {}]  }
   0x1   :  { %9 = vsyncpa [#allocation3 + $0x1], 0 }
   0x2   :  { %10 = vsyncpa [#allocation6], 0 }
   0x3   :  { %12 = vsyncpa [#allocation6 + $0x1], 0 }
   0x4   :  { %13 = vsyncpa [#allocation4], 0 }
   0x5   :  { %15 = vsyncpa [#allocation4 + $0x1], 0  ;;  %s554_s9 = smov 0   ;;  %s556_s10 = smov 0  }
   0x6   :  { %s558_s11 = smov 0   ;;  %s560_s12 = smov 0  }
   0x7 LB: > { %s575_s13 = sadd.s32 4294967295, %s534_s12   ;;  %s338_s14 = sadd.s32 4294967294, %s534_s12   ;;  %s534_s12 = sphi %s560_s12, %s774_s12   ;;  %s530_s11 = sphi %s558_s11, %s773_s11   ;;  %s526_s10 = sphi %s556_s10, %s772_s10   ;;  %s522_s9 = sphi %s554_s9, %s771_s9  }
   0x8   : > { %s579_s15 = sadd.s32 1, %s534_s12   ;;  %s28_s16 = sadd.s32 1, %s530_s11 }
   0x9   : > { %s25_s17 = ssub.s32 %s534_s12, %s579_s15  ;;  %p35_p0 = scmp.ne.s32.totalorder %s530_s11, %s526_s10 }
   0xa   : > { %p26_p1 = scmp.eq.s32.totalorder %s25_s17, 0  ;;  %p36_p2 = scmp.eq.s32.totalorder %s534_s12, 0 }
   0xb   : > { %p41_p3 = scmp.ne.s32.totalorder %s526_s10, %s522_s9  ;;  %p42_p4 = scmp.eq.s32.totalorder %s575_s13, 0 }
   0xc   : > { %s591_s18 = scalar_select %p26_p1, %s530_s11, %s28_s16  }
   0xd   : > { %p593_p5 = por %p36_p2, %p35_p0  ;;  %p597_p6 = por %p42_p4, %p41_p3 }
   0xe   : > { %p91_p7 = scmp.eq.s32.totalorder %s575_s13, 1  ;;  %p97_p8 = scmp.eq.s32.totalorder %s338_s14, 1 }
   0xf   : > { %s759_s20 = scalar_select %p597_p6, 1, 0 }
  0x10   : > { %p370_p10 = scmp.lt.s32.totalorder %s534_s12, 2  ;;  %p604_p11 = por %p91_p7, %p35_p0 }
  0x11   : > { %p608_p12 = por %p97_p8, %p41_p3  ;;  %s613_s23 = sand.u32 1, %s530_s11  }
  0x12   : > { %s760_s21 = scalar_select %p604_p11, 1, 0 }
  0x13   : > { %s761_s22 = scalar_select %p608_p12, 1, 0 }
  0x14   : > { %s342_s24 = sshll.u32 %s534_s12, 7  ;;  %s341_s25 = sshll.u32 %s613_s23, 3 }
  0x15   : > { %s622_s28 = scalar_lea.hbm %s753_s0, %s342_s24  ;;  %s121_s29 = scalar_lea.vmem [#allocation2], %s341_s25 }
  0x16   : > { %s128_s30 = sshll.u32 %s121_s29, 4  ;;  %p628_p13 = pnand %p370_p10, %p593_p5  ;;  %s632_s30 = int_to_ptr.vmem [resolvable:$true] %s128_s30 }
  0x17   : > { %s118_s4 = scalar_lea.sflag [#allocation3], %s613_s23  ;;  %s410_s5 = scalar_lea.hbm %s622_s28, 128 }
  0x18   : > { %p411_p2 = scmp.ne.s32.totalorder %s622_s28, %s410_s5  ;;  %p412_p3 = pneg %p628_p13 }
  0x19   : > { %s415_s8 = scalar_lea.hbm %s753_s0, 256  ;;  %p416_p5 = scmp.lt.s32.totalorder %s622_s28, %s753_s0 }
  0x1a   : > { %p413_p4 = pnand %p412_p3, %p411_p2  ;;  %p417_p8 = scmp.lt.s32.totalorder %s415_s8, %s410_s5 }
  0x1c   : > { %p414_p7 = pneg %p413_p4  ;;  %p418_p10 = por %p417_p8, %p416_p5 }
  0x1e   : > { %p419_p9 = pnand %p418_p10, %p414_p7 }
  0x20   : > { %422 = shalt.err (!%p419_p9)
}
  0x21   : > { %s423_s17 = scalar_lea.vmem %s632_s30, 128  ;;  %s536_s19 = smov [#allocation2]  }
  0x22   : > { %p424_p0 = scmp.ne.s32.totalorder %s632_s30, %s423_s17  ;;  %s428_s26 = sshll.u32 %s536_s19, 4  ;;  %s429_s26 = int_to_ptr.vmem [resolvable:$false] %s428_s26 }
  0x23   : > { %s430_s27 = scalar_lea.vmem %s429_s26, 256  ;;  %p431_p1 = scmp.lt.s32.totalorder %s632_s30, %s429_s26 }
  0x24   : > { %p426_p2 = pnand %p424_p0, %p412_p3  ;;  %p432_p12 = scmp.lt.s32.totalorder %s430_s27, %s423_s17 }
  0x26   : > { %p427_p4 = pneg %p426_p2  ;;  %p433_p11 = por %p432_p12, %p431_p1 }
  0x28   : > { %p434_p5 = pnand %p433_p11, %p427_p4 }
  0x2a   : > { %437 = shalt.err (!%p434_p5)
}
  0x2b   : > { %362 = dma.hbm_to_vmem [thread:$0]  (!%p628_p13), %s622_s28, 128, %s632_s30, %s118_s4  }
  0x2c   : > { %p763_p9 = scmp.lt.s32.totalorder %s534_s12, 3  ;;  %p764_p0 = scmp.ge.s32.totalorder %s534_s12, 1 }
  0x2d   : > { %s674_s7 = scalar_lea.hbm %s754_s1, %s342_s24  ;;  %s139_s8 = scalar_lea.vmem [#allocation5], %s341_s25 }
  0x2e   : > { %p665_p7 = pnand %p764_p0, %p763_p9  ;;  %s146_s14 = sshll.u32 %s139_s8, 4  ;;  %s147_s14 = int_to_ptr.vmem [resolvable:$true] %s146_s14 }
  0x2f   : > { %s136_s28 = scalar_lea.sflag [#allocation6], %s613_s23  ;;  %s438_s30 = scalar_lea.hbm %s674_s7, 128 }
  0x30   : > { %s765_s29 = scalar_select %p665_p7, 1, 0 }
  0x31   : > { %p439_p11 = scmp.ne.s32.totalorder %s674_s7, %s438_s30  ;;  %s443_s17 = scalar_lea.hbm %s754_s1, 256 }
  0x32   : > { %p444_p8 = scmp.lt.s32.totalorder %s674_s7, %s754_s1  ;;  %p445_p10 = scmp.lt.s32.totalorder %s443_s17, %s438_s30 }
  0x33   : > { %p441_p12 = pnand %p439_p11, %p412_p3 }
  0x34   : > { %p446_p2 = por %p445_p10, %p444_p8 }
  0x35   : > { %p442_p1 = pneg %p441_p12 }
  0x37   : > { %p447_p4 = pnand %p446_p2, %p442_p1 }
  0x39   : > { %450 = shalt.err (!%p447_p4)
}
  0x3a   : > { %s451_s25 = scalar_lea.vmem %s147_s14, 128  ;;  %s537_s23 = smov [#allocation5]  }
  0x3b   : > { %p452_p5 = scmp.ne.s32.totalorder %s147_s14, %s451_s25  ;;  %s456_s26 = sshll.u32 %s537_s23, 4  ;;  %s457_s26 = int_to_ptr.vmem [resolvable:$false] %s456_s26 }
  0x3c   : > { %s458_s27 = scalar_lea.vmem %s457_s26, 256  ;;  %p459_p11 = scmp.lt.s32.totalorder %s147_s14, %s457_s26 }
  0x3d   : > { %p454_p9 = pnand %p452_p5, %p412_p3  ;;  %p460_p12 = scmp.lt.s32.totalorder %s458_s27, %s451_s25 }
  0x3f   : > { %p455_p0 = pneg %p454_p9  ;;  %p461_p6 = por %p460_p12, %p459_p11 }
  0x41   : > { %p462_p7 = pnand %p461_p6, %p455_p0 }
  0x43   : > { %465 = shalt.err (!%p462_p7)
}
  0x44   : > { %365 = dma.hbm_to_vmem [thread:$0]  (!%p628_p13), %s674_s7, 128, %s147_s14, %s136_s28  }
  0x45   : > { %p766_p1 = scmp.ne.s32.totalorder %s765_s29, 0 }
  0x46   : > { %s700_s5 = sand.u32 (!%p766_p1), 1, %s526_s10   ;;  %p767_p6 = scmp.ne.s32.totalorder (!%p766_p1), %s759_s20, 0 }
  0x47   : > { %155 = sbr.rel (%p766_p1) target bundleno = 140 (0x8c), region = 28  ;;  %s703_s6 = sshll.u32 (!%p766_p1), %s700_s5, 3 }
  0x48   : > { %s158_s8 = scalar_lea.sflag (!%p766_p1), [#allocation3], %s700_s5  ;;  %s161_s30 = scalar_lea.vmem (!%p766_p1), [#allocation2], %s703_s6 }
  0x4c   : > { %509 = dma.done.wait (%p767_p6), %s158_s8, 128  }
  0x4d   : > { %511 = vsyncadd (%p767_p6), %s158_s8, 4294967168  ;;  %s167_s3 = scalar_lea.sflag [#allocation6], %s700_s5  ;;  %s170_s29 = scalar_lea.vmem [#allocation5], %s703_s6 }
  0x4e   : > { %513 = dma.done.wait (%p767_p6), %s167_s3, 128  }
  0x4f   : > { %515 = vsyncadd (%p767_p6), %s167_s3, 4294967168  ;;  %v196_v0 = vld [vmem:[%s161_s30] sm:$0xff]  ;;  %v197_v9 = vld [vmem:[%s170_s29] sm:$0xff]  ;;  %s195_s20 = scalar_lea.vmem [#allocation7], %s703_s6  ;;  %s350_s14 = sshll.u32 %s575_s13, 7 }
  0x50   : > { %v198_v1 = vand.u32 2147483647, %v196_v0  ;;  %vm216_vm0 = vcmp.ge.f32.partialorder %v196_v0, 0.0  ;;  %v202_v14 = vmax.f32 %v196_v0, 0.0  ;;  %v225_v19 = vsub.f32 1.0, %v197_v9  ;;  %s245_s7 = sshll.u32 %s195_s20, 4  ;;  %s243_s16 = scalar_lea.hbm %s755_s2, %s350_s14  ;;  %s246_s7 = int_to_ptr.vmem [resolvable:$true] %s245_s7 }
  0x51   : > { %s232_s17 = scalar_lea.sflag [#allocation4], %s700_s5  ;;  %s466_s24 = scalar_lea.vmem %s246_s7, 128 }
  0x52   : > { %v199_v2 = vsub.f32 0.0, %v198_v1  ;;  %p467_p13 = scmp.ne.s32.totalorder %s246_s7, %s466_s24  ;;  %p768_p3 = scmp.ne.s32.totalorder %s760_s21, 0 }
  0x53   : > { %s538_s19 = smov [#allocation7]  }
  0x54   : > { %v200_v3 = vmul.f32 1.442695, %v199_v2  ;;  %p468_p7 = pnand %p467_p13, %p768_p3  ;;  %s470_s25 = sshll.u32 %s538_s19, 4  ;;  %s471_s25 = int_to_ptr.vmem [resolvable:$false] %s470_s25 }
  0x55   : > { %s472_s23 = scalar_lea.vmem %s471_s25, 256  ;;  %p473_p10 = scmp.lt.s32.totalorder %s246_s7, %s471_s25 }
  0x56   : > { %404 = vpow2.f32 %v200_v3  ;;  %p469_p8 = pneg %p468_p7  ;;  %p474_p2 = scmp.lt.s32.totalorder %s472_s23, %s466_s24 }
  0x58   : > { %p475_p4 = por %p474_p2, %p473_p10 }
  0x5a   : > { %p476_p5 = pnand %p475_p4, %p469_p8 }
  0x63   : > { %v405_v4 = vpop.eup %404 }
  0x64   : > { %v203_v5 = vadd.f32 1.0, %v405_v4  ;;  %v206_v6 = vmul.f32 -0.5, %v405_v4  ;;  %v209_v8 = vand.u32 2147483647, %v405_v4  ;;  %v217_v11 = vsel %vm216_vm0, %v405_v4, 1.0 }
  0x65   : > { %v219_v12 = vsel %vm216_vm0, 1.0, %v405_v4 }
  0x66   : > { %406 = vlog2.f32 %v203_v5  ;;  %v207_v7 = vadd.f32 1.0, %v206_v6  ;;  %vm210_vm1 = vcmp.lt.f32.partialorder %v209_v8, 0.0004427343 }
  0x67   : > { %408 = vrcp.f32 %v203_v5 }
  0x68   : > { %v208_v10 = vmul.f32 %v405_v4, %v207_v7 }
  0x73   : > { %v407_v13 = vpop.eup %406 }
  0x74   : > { %v409_v15 = vpop.eup %408  ;;  %v205_v16 = vmul.f32 0.6931472, %v407_v13 }
  0x75   : > { %v218_v17 = vmul.f32 %v409_v15, %v217_v11  ;;  %v220_v18 = vmul.f32 %v409_v15, %v219_v12 }
  0x76   : > { %v211_v20 = vsel %vm210_vm1, %v208_v10, %v205_v16 }
  0x77   : > { %v212_v21 = vadd.f32 %v211_v20, %v202_v14  ;;  %v221_v22 = vmul.f32 %v218_v17, %v218_v17  ;;  %v222_v23 = vmul.f32 %v220_v18, %v220_v18 }
  0x79   : > { %v213_v24 = vsub.f32 %v212_v21, %v196_v0  ;;  %v223_v25 = vmul.f32 %v221_v22, %v197_v9  ;;  %v226_v26 = vmul.f32 %v225_v19, %v222_v23 }
  0x7b   : > { %v224_v27 = vmul.f32 %v223_v25, %v213_v24  ;;  %v227_v28 = vmul.f32 %v226_v26, %v212_v21 }
  0x7d   : > { %v228_v29 = vadd.f32 %v227_v28, %v224_v27 }
  0x7f   : > { %230 = vst [vmem:[%s195_s20] sm:$0xff] %v228_v29 }
  0x80   : > { %479 = shalt.err (!%p476_p5)
}
  0x81   : > { %s480_s13 = scalar_lea.hbm %s243_s16, 128  ;;  %s484_s5 = scalar_lea.hbm %s755_s2, 256 }
  0x82   : > { %p481_p9 = scmp.ne.s32.totalorder %s243_s16, %s480_s13  ;;  %p485_p12 = scmp.lt.s32.totalorder %s243_s16, %s755_s2 }
  0x83   : > { %p486_p1 = scmp.lt.s32.totalorder %s484_s5, %s480_s13 }
  0x84   : > { %p482_p0 = pnand %p481_p9, %p768_p3 }
  0x85   : > { %p487_p6 = por %p486_p1, %p485_p12 }
  0x86   : > { %p483_p11 = pneg %p482_p0 }
  0x88   : > { %p488_p13 = pnand %p487_p6, %p483_p11 }
  0x8a   : > { %491 = shalt.err (!%p488_p13)
}
  0x8b   : > { %357 = dma.vmem_to_hbm [thread:$0]  (%p768_p3), %s246_s7, 128, %s243_s16, %s232_s17  }
  0x8c PF: > { %s257_s30 = sand.u32 1, %s522_s9   ;;  %p769_p7 = scmp.ne.s32.totalorder %s761_s22, 0 }
  0x8d   : > { %p770_p8 = scmp.ge.s32.totalorder %s534_s12, 2  ;;  %s258_s3 = scalar_lea.sflag [#allocation4], %s257_s30 }
  0x8f   : > { %p367_p10 = pnand %p770_p8, %p769_p7 }
  0x91   : > { %p368_p2 = pneg %p367_p10 }
  0x93   : > { %517 = dma.done.wait (%p368_p2), %s258_s3, 128  }
  0x94   : > { %519 = vsyncadd (%p368_p2), %s258_s3, 4294967168  ;;  %p18_p4 = scmp.ge.s32.totalorder %s579_s15, 4   ;;  %s771_s9 = smov %s526_s10 }
  0x95   : > { %s772_s10 = smov %s530_s11  ;;  %s773_s11 = smov %s591_s18 }
  0x96   : > { %s774_s12 = smov %s579_s15  ;;  %20 = sbr.rel (!%p18_p4) target bundleno = 7 (0x7), region = 86 }
  0x9b   :  { %263 = vsyncpa [#allocation3], 1 }
  0x9c   :  { %265 = vsyncpa [#allocation3 + $0x1], 1 }
  0x9d   :  { %266 = vsyncpa [#allocation6], 1 }
  0x9e   :  { %268 = vsyncpa [#allocation6 + $0x1], 1 }
  0x9f   :  { %269 = vsyncpa [#allocation4], 1 }
  0xa0   :  { %271 = vsyncpa [#allocation4 + $0x1], 1 }

</bundles_post_ra>
